<compile_context>
chip_gen: v6e
topology: v6e:2x2x1
jax: 0.10.0
libtpu: 0.0.40
codegen_flags: <defaults>
</compile_context>

<pallas_src>
from functools import partial

import jax
import jax.numpy as jnp
import numpy as np
from jax.experimental import pallas as pl
from jax.experimental.pallas import tpu as pltpu


def _round_up(x, m):
    return (x + m - 1) // m * m


_VMEM_CAP_CACHE = [None]


def _vmem_capacity_bytes():
    """Physical VMEM of the current chip; conservative (v7x) fallback if unknown."""
    if _VMEM_CAP_CACHE[0] is None:
        cap = 64 << 20
        try:
            info = pltpu.get_tpu_info()
            got = getattr(info, "vmem_capacity_bytes", None)
            if got:
                cap = int(got)
        except Exception:
            pass
        _VMEM_CAP_CACHE[0] = cap
    return _VMEM_CAP_CACHE[0]


def _ce_kernel(logits_ref, tgt_ref, cw_ref, loss_ref, cnt_ref, *,
               c, tn, l_valid, loss_scale):
    j = pl.program_id(1)

    # counts block is resident across the whole L axis of one batch row: init at j==0.
    @pl.when(j == 0)
    def _init():
        cnt_ref[...] = jnp.zeros_like(cnt_ref)

    logits = logits_ref[0].astype(jnp.float32)          # (C, TN), cast in-kernel
    tgt = tgt_ref[0]                                    # (1, TN) int32
    cw = cw_ref[...]                                    # (C, 1)  f32

    cls = jax.lax.broadcasted_iota(jnp.int32, (c, tn), 0)            # (C, TN)
    onehot = (cls == tgt).astype(jnp.float32)                        # (C, TN)

    # numerically stable log-sum-exp over the class (sublane) axis
    mx = jnp.max(logits, axis=0, keepdims=True)                      # (1, TN)
    lse = mx + jnp.log(jnp.sum(jnp.exp(logits - mx), axis=0, keepdims=True))
    tgt_logit = jnp.sum(logits * onehot, axis=0, keepdims=True)      # (1, TN)
    w_row = jnp.sum(cw * onehot, axis=0, keepdims=True)              # (1, TN)

    # mask lanes past the real spatial extent (remainder block of the L axis)
    lane = jax.lax.broadcasted_iota(jnp.int32, (1, tn), 1) + j * tn
    valid = lane < l_valid

    ce = loss_scale * w_row * (lse - tgt_logit)
    loss_ref[0] = jnp.where(valid, ce, 0.0).astype(loss_ref.dtype)

    # argmax over classes (first occurrence, like torch.argmax), as integers
    pred = jnp.min(jnp.where(logits == mx, cls, c), axis=0, keepdims=True)
    correct = jnp.where(jnp.logical_and(valid, pred == tgt), 1, 0).astype(jnp.int32)
    cnt_ref[0] += correct        # per-lane int32 partial counts, pure VPU add


@partial(jax.jit, static_argnames=("loss_scale",))
def _ce_pallas(logits_f, targets_f, class_w, *, loss_scale):
    """logits_f: (B, C, L) float; targets_f: (B, 1, L) int32; class_w: (C,) f32."""
    B, C, L = logits_f.shape
    itemsize = np.dtype(logits_f.dtype).itemsize
    loss_dtype = (logits_f.dtype if jnp.issubdtype(logits_f.dtype, jnp.floating)
                  else jnp.float32)

    # Lane tile: ~2 MiB of logits per (double-buffered) block -- large enough to
    # amortize per-grid-step overhead, small enough for every generation's VMEM.
    tn = ((2 << 20) // (C * itemsize)) // 128 * 128
    tn = max(128, min(tn, 32 * 1024, _round_up(L, 128)))
    nj = pl.cdiv(L, tn)

    # Explicit VMEM budget: 2x-buffered logits/targets/loss blocks + resident counts
    # block + headroom for kernel-internal temporaries, capped below physical VMEM.
    bytes_per_step = tn * (C * itemsize + 4 + np.dtype(loss_dtype).itemsize + 4)
    vmem_limit = int(min(max(2 * bytes_per_step + (16 << 20), 32 << 20),
                         _vmem_capacity_bytes() - (16 << 20)))
    # TODO(synk): very large class counts (C*128*itemsize approaching VMEM) want a
    # class-chunked streaming logsumexp / running-argmax instead of one (C, tn) block.

    cw_col = class_w.astype(jnp.float32).reshape(C, 1)

    loss_p, counts = pl.pallas_call(
        partial(_ce_kernel, c=C, tn=tn, l_valid=L, loss_scale=float(loss_scale)),
        grid=(B, nj),
        in_specs=[
            pl.BlockSpec((1, C, tn), lambda b, j: (b, 0, j)),
            pl.BlockSpec((1, 1, tn), lambda b, j: (b, 0, j)),
            pl.BlockSpec((C, 1), lambda b, j: (0, 0)),
        ],
        out_specs=(
            pl.BlockSpec((1, 1, tn), lambda b, j: (b, 0, j)),
            # per-batch-row accumulator: same block across the (arbitrary) L axis
            pl.BlockSpec((1, 1, tn), lambda b, j: (b, 0, 0)),
        ),
        out_shape=(
            jax.ShapeDtypeStruct((B, 1, L), loss_dtype),
            jax.ShapeDtypeStruct((B, 1, tn), jnp.int32),
        ),
        compiler_params=pltpu.CompilerParams(
            # batch axis is embarrassingly parallel (v7x megacore); L axis revisits
            # the counts block, so it stays "arbitrary".
            dimension_semantics=("parallel", "arbitrary"),
            vmem_limit_bytes=vmem_limit),
    )(logits_f, targets_f, cw_col)

    acc = jnp.sum(counts).astype(jnp.float32) / float(B * L)
    return loss_p[:, 0, :], 1.0 - acc


@partial(jax.jit, static_argnames=("loss_scale",))
def _ce_jax(model_output, targets, class_w, *, loss_scale):
    """Fused-XLA path for tiny problems (kernel launch overhead dominates there)."""
    logits = model_output.astype(jnp.float32)
    logp = jax.nn.log_softmax(logits, axis=1)
    nll = -jnp.take_along_axis(logp, targets[:, None], axis=1)[:, 0]
    loss = loss_scale * class_w[targets] * nll
    pred = jnp.argmax(logits, axis=1)
    acc = jnp.mean((pred == targets).astype(jnp.float32))
    return loss.astype(model_output.dtype
                       if jnp.issubdtype(model_output.dtype, jnp.floating)
                       else jnp.float32), 1.0 - acc


class LossCrossEntropyPallas:
    """JAX/Pallas port of LossCrossEntropy. No learnable parameters."""

    def __init__(self, target_name, weight=1.0, class_weights=None,
                 weight_min_max_adaptative=(None, None), reduction="none",
                 min_pallas_elements=1 << 14):
        self.target_name = target_name
        self.weight = float(weight)
        if isinstance(class_weights, str):
            assert class_weights in ("adaptative",)
            self.class_weights = class_weights
        else:
            self.class_weights = (jnp.asarray(class_weights, dtype=jnp.float32)
                                  if class_weights is not None else None)
        if weight_min_max_adaptative[0] is not None or weight_min_max_adaptative[1] is not None:
            self.weight_min_max_adaptative = weight_min_max_adaptative
        else:
            self.weight_min_max_adaptative = None
        self.reduction = reduction
        self.min_pallas_elements = min_pallas_elements

    def _resolve_class_weights(self, targets, num_classes):
        if isinstance(self.class_weights, str):  # 'adaptative'
            nb_classes = jnp.bincount(targets.reshape(-1), length=num_classes)
            w = float(targets.size) / nb_classes.astype(jnp.float32) / 5.0
            if self.weight_min_max_adaptative is not None:
                w = jnp.clip(w, self.weight_min_max_adaptative[0],
                             self.weight_min_max_adaptative[1])
            return w
        if self.class_weights is not None:
            assert self.class_weights.shape[0] == num_classes
            return self.class_weights
        return jnp.ones((num_classes,), jnp.float32)

    def __call__(self, batch, model_output):
        targets = batch[self.target_name]
        assert model_output.shape[0] == targets.shape[0]
        if model_output.ndim == targets.ndim:
            assert targets.shape[1] == 1
            assert model_output.shape[2:] == targets.shape[2:]
            targets = jnp.squeeze(targets, axis=1)
        targets = targets.astype(jnp.int32)      # class indices stay integer end-to-end
        num_classes = model_output.shape[1]
        class_w = self._resolve_class_weights(targets, num_classes)

        total = int(targets.size)
        if model_output.ndim == 2:
            l_flat = model_output.shape[0]
        else:
            l_flat = int(np.prod(model_output.shape[2:]))
        use_pallas = total >= self.min_pallas_elements and l_flat >= 128

        if not use_pallas:
            loss, one_minus_acc = _ce_jax(model_output, targets, class_w,
                                          loss_scale=self.weight)
        else:
            # Canonicalize to (B, C, L): class axis on sublanes, flattened spatial
            # (or batch, for 2-D inputs) on lanes -> lane-dense blocks.
            if model_output.ndim == 2:
                # TODO(synk): a (tm, C)-block kernel variant would avoid this
                # transpose copy for 2-D (classification) inputs.
                n = model_output.shape[0]
                logits_f = jnp.transpose(model_output)[None]       # (1, C, N)
                targets_f = targets.reshape(1, 1, n)
            else:
                n = model_output.shape[0]
                logits_f = model_output.reshape(n, num_classes, l_flat)
                targets_f = targets.reshape(n, 1, l_flat)
            loss_flat, one_minus_acc = _ce_pallas(logits_f, targets_f, class_w,
                                                  loss_scale=self.weight)
            loss = loss_flat.reshape(targets.shape)

        if self.reduction == "none":
            loss_out = loss
        elif self.reduction == "sum":
            loss_out = jnp.sum(loss)
        elif self.reduction == "mean":
            loss_out = jnp.sum(loss) / jnp.sum(class_w[targets])
        else:
            raise ValueError(f"unsupported reduction: {self.reduction}")

        return {
            "metrics": {"1-accuracy": one_minus_acc},
            "losses": {"ce": loss_out},
        }


if __name__ == "__main__":
    N, C, H, W = 2, 4, 16, 16
    key = jax.random.PRNGKey(0)
    k_logits, k_tgt = jax.random.split(key)

    model_output = jax.random.normal(k_logits, (N, C, H, W), dtype=jnp.float32)
    targets = jax.random.randint(k_tgt, (N, 1, H, W), 0, C, dtype=jnp.int32)
    batch = {"seg": targets}

    class_weights = (1.0, 2.0, 0.5, 1.5)
    loss_mod = LossCrossEntropyPallas("seg", weight=0.7, class_weights=class_weights,
                                      reduction="none",
                                      min_pallas_elements=0)  # force the Pallas path
    result = loss_mod(batch, model_output)
    loss = jax.block_until_ready(result["losses"]["ce"])
    one_minus_acc = jax.block_until_ready(result["metrics"]["1-accuracy"])

    # Pure-JAX reference (same math as torch.nn.functional.cross_entropy).
    t = jnp.squeeze(targets, axis=1)
    logp = jax.nn.log_softmax(model_output, axis=1)
    nll = -jnp.take_along_axis(logp, t[:, None], axis=1)[:, 0]
    w_t = jnp.asarray(class_weights, dtype=jnp.float32)[t]
    ref_loss = 0.7 * w_t * nll
    ref_acc = jnp.mean((jnp.argmax(model_output, axis=1) == t).astype(jnp.float32))

    assert loss.shape == t.shape
    assert np.allclose(np.asarray(loss), np.asarray(ref_loss), atol=1e-5, rtol=1e-5)
    assert np.allclose(float(one_minus_acc), float(1.0 - ref_acc), atol=1e-6)

    print("KERNEL_OK")
</pallas_src>

<mosaic_0001>
module attributes {stable_mosaic.version = 11 : i64} {
  func.func @_ce_kernel(%arg0: i32, %arg1: i32, %arg2: memref<1x4x256xf32, #tpu.memory_space<vmem>>, %arg3: memref<1x1x256xi32, #tpu.memory_space<vmem>>, %arg4: memref<4x1xf32, #tpu.memory_space<vmem>>, %arg5: memref<1x1x256xf32, #tpu.memory_space<vmem>>, %arg6: memref<1x1x256xi32, #tpu.memory_space<vmem>>) attributes {dimension_semantics = [#tpu.dimension_semantics<parallel>, #tpu.dimension_semantics<arbitrary>], iteration_bounds = array<i64: 2, 1>, scalar_prefetch = 0 : i64, scratch_operands = 0 : i64, tpu.core_type = #tpu.core_type<tc>, window_params = [{transform_indices = @transform_0, window_bounds = array<i64: 1, 4, 256>}, {transform_indices = @transform_1, window_bounds = array<i64: 1, 1, 256>}, {pipeline_mode = #tpu.pipeline_mode<synchronous>, transform_indices = @transform_2, window_bounds = array<i64: 4, 1>}, {transform_indices = @transform_3, window_bounds = array<i64: 1, 1, 256>}, {transform_indices = @transform_4, window_bounds = array<i64: 1, 1, 256>}]} {
    %c0_i32 = arith.constant 0 : i32
    %0 = arith.cmpi eq, %arg1, %c0_i32 : i32
    %1 = arith.extui %0 : i1 to i32
    %c0_i32_0 = arith.constant 0 : i32
    %2 = arith.cmpi ne, %1, %c0_i32_0 : i32
    scf.if %2 {
      %c0_i32_25 = arith.constant 0 : i32
      %61 = vector.broadcast %c0_i32_25 : i32 to vector<1x1x256xi32>
      %c0_26 = arith.constant 0 : index
      %c0_27 = arith.constant 0 : index
      %c0_28 = arith.constant 0 : index
      %62 = vector.load %arg6[%c0_26, %c0_27, %c0_28] : memref<1x1x256xi32, #tpu.memory_space<vmem>>, vector<1x1x256xi32>
      tpu.vector_store %arg6[%c0_26, %c0_27, %c0_28], %61 {strides = array<i32>} : memref<1x1x256xi32, #tpu.memory_space<vmem>>, vector<1x1x256xi32>,
    } else {
    }
    %c0 = arith.constant 0 : index
    %c0_1 = arith.constant 0 : index
    %c0_2 = arith.constant 0 : index
    %3 = vector.load %arg2[%c0, %c0_1, %c0_2] : memref<1x4x256xf32, #tpu.memory_space<vmem>>, vector<1x4x256xf32>
    %4 = vector.shape_cast %3 : vector<1x4x256xf32> to vector<4x256xf32>
    %c0_3 = arith.constant 0 : index
    %c0_4 = arith.constant 0 : index
    %c0_5 = arith.constant 0 : index
    %5 = vector.load %arg3[%c0_3, %c0_4, %c0_5] : memref<1x1x256xi32, #tpu.memory_space<vmem>>, vector<1x1x256xi32>
    %6 = vector.shape_cast %5 : vector<1x1x256xi32> to vector<1x256xi32>
    %c0_6 = arith.constant 0 : index
    %c0_7 = arith.constant 0 : index
    %7 = vector.load %arg4[%c0_6, %c0_7] : memref<4x1xf32, #tpu.memory_space<vmem>>, vector<4x1xf32>
    %8 = tpu.iota {dimensions = array<i32: 0>} : vector<4x256xi32>
    %9 = vector.broadcast %6 : vector<1x256xi32> to vector<4x256xi32>
    %10 = arith.cmpi eq, %8, %9 : vector<4x256xi32>
    %11 = arith.extui %10 : vector<4x256xi1> to vector<4x256xi32>
    %12 = arith.sitofp %11 : vector<4x256xi32> to vector<4x256xf32>
    %cst = arith.constant dense<0xFF800000> : vector<256xf32>
    %13 = vector.multi_reduction <maximumf>, %4, %cst [0] : vector<4x256xf32> to vector<256xf32>
    %14 = vector.shape_cast %13 : vector<256xf32> to vector<1x256xf32>
    %15 = vector.broadcast %14 : vector<1x256xf32> to vector<4x256xf32>
    %16 = arith.subf %4, %15 : vector<4x256xf32>
    %17 = math.exp %16 : vector<4x256xf32>
    %cst_8 = arith.constant dense<0.000000e+00> : vector<256xf32>
    %18 = vector.multi_reduction <add>, %17, %cst_8 [0] : vector<4x256xf32> to vector<256xf32>
    %19 = vector.shape_cast %18 : vector<256xf32> to vector<1x256xf32>
    %20 = math.log %19 : vector<1x256xf32>
    %21 = arith.addf %14, %20 : vector<1x256xf32>
    %22 = arith.mulf %4, %12 : vector<4x256xf32>
    %cst_9 = arith.constant dense<0.000000e+00> : vector<256xf32>
    %23 = vector.multi_reduction <add>, %22, %cst_9 [0] : vector<4x256xf32> to vector<256xf32>
    %24 = vector.shape_cast %23 : vector<256xf32> to vector<1x256xf32>
    %25 = vector.broadcast %7 : vector<4x1xf32> to vector<4x256xf32>
    %26 = arith.mulf %25, %12 : vector<4x256xf32>
    %cst_10 = arith.constant dense<0.000000e+00> : vector<256xf32>
    %27 = vector.multi_reduction <add>, %26, %cst_10 [0] : vector<4x256xf32> to vector<256xf32>
    %28 = vector.shape_cast %27 : vector<256xf32> to vector<1x256xf32>
    %29 = tpu.iota {dimensions = array<i32: 1>} : vector<1x256xi32>
    %c256_i32 = arith.constant 256 : i32
    %30 = arith.muli %arg1, %c256_i32 : i32
    %31 = vector.broadcast %30 : i32 to vector<1x256xi32>
    %32 = arith.addi %29, %31 : vector<1x256xi32>
    %c256_i32_11 = arith.constant 256 : i32
    %33 = vector.broadcast %c256_i32_11 : i32 to vector<1x256xi32>
    %34 = arith.cmpi slt, %32, %33 : vector<1x256xi32>
    %cst_12 = arith.constant 0.699999988 : f32
    %35 = vector.broadcast %cst_12 : f32 to vector<1x256xf32>
    %36 = arith.mulf %35, %28 : vector<1x256xf32>
    %37 = arith.subf %21, %24 : vector<1x256xf32>
    %38 = arith.mulf %36, %37 : vector<1x256xf32>
    %cst_13 = arith.constant 0.000000e+00 : f32
    %39 = vector.broadcast %cst_13 : f32 to vector<1x256xf32>
    %40 = arith.select %34, %38, %39 : vector<1x256xi1>, vector<1x256xf32>
    %c0_14 = arith.constant 0 : index
    %c0_15 = arith.constant 0 : index
    %c0_16 = arith.constant 0 : index
    %41 = vector.load %arg5[%c0_14, %c0_15, %c0_16] : memref<1x1x256xf32, #tpu.memory_space<vmem>>, vector<1x1x256xf32>
    %42 = vector.shape_cast %41 : vector<1x1x256xf32> to vector<1x256xf32>
    %43 = vector.shape_cast %40 : vector<1x256xf32> to vector<1x1x256xf32>
    tpu.vector_store %arg5[%c0_14, %c0_15, %c0_16], %43 {strides = array<i32>} : memref<1x1x256xf32, #tpu.memory_space<vmem>>, vector<1x1x256xf32>,
    %44 = vector.broadcast %14 : vector<1x256xf32> to vector<4x256xf32>
    %45 = arith.cmpf oeq, %4, %44 : vector<4x256xf32>
    %c4_i32 = arith.constant 4 : i32
    %46 = vector.broadcast %c4_i32 : i32 to vector<4x256xi32>
    %47 = arith.select %45, %8, %46 : vector<4x256xi1>, vector<4x256xi32>
    %cst_17 = arith.constant dense<2147483647> : vector<256xi32>
    %48 = vector.multi_reduction <minsi>, %47, %cst_17 [0] : vector<4x256xi32> to vector<256xi32>
    %49 = vector.shape_cast %48 : vector<256xi32> to vector<1x256xi32>
    %50 = arith.cmpi eq, %49, %6 : vector<1x256xi32>
    %51 = arith.andi %34, %50 : vector<1x256xi1>
    %c1_i32 = arith.constant 1 : i32
    %c0_i32_18 = arith.constant 0 : i32
    %52 = vector.broadcast %c1_i32 : i32 to vector<1x256xi32>
    %53 = vector.broadcast %c0_i32_18 : i32 to vector<1x256xi32>
    %54 = arith.select %51, %52, %53 : vector<1x256xi1>, vector<1x256xi32>
    %c0_19 = arith.constant 0 : index
    %c0_20 = arith.constant 0 : index
    %c0_21 = arith.constant 0 : index
    %55 = vector.load %arg6[%c0_19, %c0_20, %c0_21] : memref<1x1x256xi32, #tpu.memory_space<vmem>>, vector<1x1x256xi32>
    %56 = vector.shape_cast %55 : vector<1x1x256xi32> to vector<1x256xi32>
    %57 = arith.addi %56, %54 : vector<1x256xi32>
    %c0_22 = arith.constant 0 : index
    %c0_23 = arith.constant 0 : index
    %c0_24 = arith.constant 0 : index
    %58 = vector.load %arg6[%c0_22, %c0_23, %c0_24] : memref<1x1x256xi32, #tpu.memory_space<vmem>>, vector<1x1x256xi32>
    %59 = vector.shape_cast %58 : vector<1x1x256xi32> to vector<1x256xi32>
    %60 = vector.shape_cast %57 : vector<1x256xi32> to vector<1x1x256xi32>
    tpu.vector_store %arg6[%c0_22, %c0_23, %c0_24], %60 {strides = array<i32>} : memref<1x1x256xi32, #tpu.memory_space<vmem>>, vector<1x1x256xi32>,
    return
  }
  func.func @transform_0(%arg0: i32, %arg1: i32) -> (i32, i32, i32) {
    %c0_i32 = arith.constant 0 : i32
    %c0_i32_0 = arith.constant 0 : i32
    return %arg0, %c0_i32, %arg1 : i32, i32, i32
  }
  func.func @transform_1(%arg0: i32, %arg1: i32) -> (i32, i32, i32) {
    %c0_i32 = arith.constant 0 : i32
    %c0_i32_0 = arith.constant 0 : i32
    return %arg0, %c0_i32, %arg1 : i32, i32, i32
  }
  func.func @transform_2(%arg0: i32, %arg1: i32) -> (i32, i32) {
    %c0_i32 = arith.constant 0 : i32
    %c0_i32_0 = arith.constant 0 : i32
    %c0_i32_1 = arith.constant 0 : i32
    return %c0_i32, %c0_i32_0 : i32, i32
  }
  func.func @transform_3(%arg0: i32, %arg1: i32) -> (i32, i32, i32) {
    %c0_i32 = arith.constant 0 : i32
    %c0_i32_0 = arith.constant 0 : i32
    return %arg0, %c0_i32, %arg1 : i32, i32, i32
  }
  func.func @transform_4(%arg0: i32, %arg1: i32) -> (i32, i32, i32) {
    %c0_i32 = arith.constant 0 : i32
    %c0_i32_0 = arith.constant 0 : i32
    %c0_i32_1 = arith.constant 0 : i32
    return %arg0, %c0_i32, %c0_i32_0 : i32, i32, i32
  }
}

</mosaic_0001>

<bundles_post_ra>
// kernel: _ce_pallas.1
= control target key start
LH: loop header
LB: loop body
LE: loop exit
PB: predicated region body
PF: predicated region fallthrough
CT: control target
= control target key end

     0   :  { %10 = vsyncpa [#allocation3], 0  ;;  %s1010_s0 = inlined_call_operand.hbm [shape: f32[2,4,256], index: 0, kind: input, shape index: {}]   ;;  %s1011_s1 = inlined_call_operand.vmem [shape: s32[2,1,256], index: 1, kind: input, shape index: {}]   ;;  %s1012_s2 = inlined_call_operand.vmem [shape: f32[4,1], index: 2, kind: input, shape index: {}]   ;;  %s1013_s3 = inlined_call_operand.vmem [shape: f32[2,1,256], index: 3, kind: output, shape index: {0}]   ;;  %s1014_s4 = inlined_call_operand.vmem [shape: s32[2,1,256], index: 4, kind: output, shape index: {1}]  }
   0x1   :  { %12 = vsyncpa [#allocation3 + $0x1], 0  ;;  %s828_s15 = smov 0   ;;  %s830_s16 = smov 0  }
   0x2   :  { %s832_s17 = smov 0   ;;  %s834_s18 = smov 0  }
   0x3   :  { %s836_s19 = smov 0   ;;  %s838_s20 = smov 0  }
   0x4 LB: > { %s634_s21 = sadd.s32 4294967295, %s796_s20   ;;  %s30_s22 = sadd.s32 1, %s792_s19  ;;  %s796_s20 = sphi %s838_s20, %s18_s20   ;;  %s792_s19 = sphi %s836_s19, %s1024_s19   ;;  %s788_s18 = sphi %s834_s18, %s1023_s18   ;;  %s784_s17 = sphi %s832_s17, %s1022_s17   ;;  %s780_s16 = sphi %s830_s16, %s1021_s16   ;;  %s776_s15 = sphi %s828_s15, %s1020_s15  }
   0x5   : > { %p32_p0 = scmp.ge.s32.totalorder %s30_s22, 2  ;;  %s39_s23 = sadd.s32 1, %s784_s17 }
   0x6   : > { %p46_p1 = scmp.ne.s32.totalorder %s784_s17, %s780_s16  ;;  %p47_p2 = scmp.eq.s32.totalorder %s796_s20, 0 }
   0x7   : > { %s1026_s22 = smov (%p32_p0, %s30_s22), 0  ;;  %p52_p4 = scmp.ne.s32.totalorder %s780_s16, %s776_s15 }
   0x8   : > { %p864_p3 = por %p47_p2, %p46_p1  ;;  %s34_s25 = ssub.s32 %s792_s19, %s1026_s22 }
   0x9   : > { %p53_p5 = scmp.eq.s32.totalorder %s634_s21, 0  ;;  %p37_p6 = scmp.eq.s32.totalorder %s34_s25, 0 }
   0xa   : > { %p657_p8 = scmp.lt.s32.totalorder %s796_s20, 2  ;;  %s182_s28 = sand.u32 1, %s784_s17  }
   0xb   : > { %p871_p7 = por %p53_p5, %p52_p4  ;;  %s650_s29 = sshll.u32 %s792_s19, 7 }
   0xc   : > { %s877_s27 = scalar_select %p37_p6, %s784_s17, %s39_s23  }
   0xd   : > { %s638_s30 = sshll.u32 %s182_s28, 3  ;;  %s194_s7 = scalar_lea.hbm %s1010_s0, %s650_s29 }
   0xe   : > { %s186_s8 = scalar_lea.vmem [#allocation2], %s638_s30  ;;  %p886_p9 = pnand %p657_p8, %p864_p3 }
   0xf   : > { %s196_s9 = sshll.u32 %s186_s8, 4  ;;  %p641_p10 = scmp.ge.s32.totalorder %s796_s20, 1  ;;  %s197_s9 = int_to_ptr.vmem [resolvable:$true] %s196_s9 }
  0x10   : > { %p213_p11 = scmp.lt.s32.totalorder %s796_s20, 3  ;;  %s183_s11 = scalar_lea.sflag [#allocation3], %s182_s28 }
  0x11   : > { %p720_p12 = pneg %p886_p9  ;;  %s731_s12 = scalar_lea.vmem %s197_s9, 128 }
  0x12   : > { %p732_p13 = scmp.ne.s32.totalorder %s197_s9, %s731_s12  ;;  %s798_s13 = smov [#allocation2]  }
  0x13   : > { %s736_s14 = sshll.u32 %s798_s13, 4  ;;  %s737_s14 = int_to_ptr.vmem [resolvable:$false] %s736_s14 }
  0x14   : > { %p734_p0 = pnand %p732_p13, %p720_p12  ;;  %s738_s15 = scalar_lea.vmem %s737_s14, 256 }
  0x15   : > { %p739_p2 = scmp.lt.s32.totalorder %s197_s9, %s737_s14  ;;  %p740_p3 = scmp.lt.s32.totalorder %s738_s15, %s731_s12 }
  0x16   : > { %p735_p1 = pneg %p734_p0 }
  0x17   : > { %p741_p4 = por %p740_p3, %p739_p2 }
  0x19   : > { %p742_p5 = pnand %p741_p4, %p735_p1 }
  0x1b   : > { %745 = shalt.err (!%p742_p5)
}
  0x1c   : > { %656 = dma.hbm_to_vmem [thread:$0]  (!%p886_p9), %s194_s7, 128, %s197_s9, %s183_s11  }
  0x1d   : > { %p214_p6 = pnand %p641_p10, %p213_p11 }
  0x1e   : > { %s219_s21 = sand.u32 (!%p214_p6), 1, %s780_s16  }
  0x1f   : > { %217 = sbr.rel (%p214_p6) target bundleno = 189 (0xbd), region = 32  ;;  %s642_s23 = sshll.u32 (!%p214_p6), %s219_s21, 3 }
  0x20   : > { %s220_s24 = scalar_lea.sflag (!%p214_p6), [#allocation3], %s219_s21  ;;  %s223_s25 = scalar_lea.vmem (!%p214_p6), [#allocation2], %s642_s23 }
  0x24   : > { %771 = dma.done.wait (%p871_p7), %s220_s24, 128  }
  0x25   : > { %773 = vsyncadd (%p871_p7), %s220_s24, 4294967168  ;;  %p265_p8 = scmp.lt.s32.totalorder %s788_s18, 1  ;;  %v290_v0 = vlaneseq  ;;  %v799_v1 = vmov 0   ;;  %vm317_vm1 = vcmask 1043456   ;;  %v297_v6 = vld [vmem:[%s1012_s2] sm:$0xf] }
  0x26   : > { %710 = vset.pattern.permute.xlu0 %v799_v1  ;;  %v295_v7 = vld [vmem:[%s223_s25] sm:$0xff]  ;;  %v800_v12 = vmov 839922192   ;;  %v801_v17 = vmov 0.0   ;;  %v802_v48 = vmov 1966171168  }
  0x27   : > { %s1028_s18 = smov (!%p265_p8, %s788_s18), 1  ;;  %v908_v2 = vshrl.u32 %v290_v0, 7  ;;  %vm910_vm0 = vcmp.lt.s32.totalorder %v290_v0, 256  ;;  %386 = vperm.xlu0 %710, %v297_v6   ;;  %v315_v11 = vcombine.high %v295_v7, %v295_v7  ;;  %v447_v13 = vunpack.c.l.s4 %v800_v12 }
  0x28   : > { %s914_s28 = sshll.u32 %s1028_s18, 1  ;;  %v318_v14 = vsel %vm317_vm1, %v295_v7, -inf  ;;  %v426_v49 = vunpack.c.l.s4 %v802_v48 }
  0x29   : > { %v302_v4 = vsub.s32 0, %v908_v2  ;;  %v306_v5 = vsub.s32 1, %v908_v2  ;;  %s922_s30 = scalar_lea.vmem %s1014_s4, %s914_s28  ;;  %s271_s18 = scalar_lea.vmem %s1011_s1, %s914_s28  ;;  %v319_v15 = vrot.slane %v318_v14, 4  ;;  %v325_v16 = vsel %vm317_vm1, %v315_v11, -inf }
  0x2a   : > { %294 = vst.msk [vmem:[%s922_s30] sm:$0x3] %vm910_vm0, %v799_v1  ;;  %v296_v8 = vld [vmem:[%s271_s18] sm:$0x3]  ;;  %v326_v20 = vrot.slane %v325_v16, 4  ;;  %v448_v24 = vunpack.c.0.s8 %v447_v13  ;;  %v427_v54 = vunpack.c.0.s8 %v426_v49  ;;  %s280_s11 = scalar_lea.vmem %s1013_s3, %s914_s28 }
  0x2b   : > { %v935_v9 = vrot.slane %v296_v8, %v302_v4  ;;  %v937_v10 = vrot.slane %v296_v8, %v306_v5  ;;  %v320_v21 = vmax.f32 %v318_v14, %v319_v15 }
  0x2c   : > { %v327_v23 = vmax.f32 %v325_v16, %v326_v20  ;;  %v451_v30 = vsub.s32 %v448_v24, %v908_v2  ;;  %v963_v59 = vsub.s32 %v427_v54, %v908_v2 }
  0x2d   : > { %vm308_vm2 = vcmp.eq.s32.totalorder %v908_v2, %v935_v9  ;;  %vm309_vm3 = vcmp.eq.s32.totalorder %v908_v2, %v937_v10  ;;  %v321_v25 = vrot.slane %v320_v21, 2 }
  0x2e   : > { %v945_v18 = vsel %vm308_vm2, 1.0, %v801_v17  ;;  %v947_v19 = vsel %vm309_vm3, 1.0, %v801_v17  ;;  %v328_v27 = vrot.slane %v327_v23, 2  ;;  %v452_v35 = vrot.slane %v908_v2, %v451_v30 }
  0x2f   : > { %v364_v22 = vcombine.low %v945_v18, %v947_v19  ;;  %v322_v28 = vmax.f32 %v320_v21, %v321_v25 }
  0x30   : > { %v329_v29 = vmax.f32 %v327_v23, %v328_v27 }
  0x31   : > { %v366_v26 = vmul.f32 %v364_v22, %v295_v7  ;;  %v323_v31 = vrot.slane %v322_v28, 1 }
  0x32   : > { %v330_v32 = vrot.slane %v329_v29, 1 }
  0x33   : > { %v952_v33 = vmax.f32 %v322_v28, %v323_v31  ;;  %v368_v6 = vcombine.high %v366_v26, %v366_v26 }
  0x34   : > { %v954_v34 = vmax.f32 %v329_v29, %v330_v32 }
  0x35   : > { %v377_v14 = vsel %vm317_vm1, %v368_v6, 0.0 }
  0x36   : > { %v334_v36 = vcombine.low %v952_v33, %v954_v34  ;;  %v378_v22 = vrot.slane %v377_v14, 4 }
  0x38   : > { %v336_v37 = vsub.f32 %v295_v7, %v334_v36  ;;  %vm445_vm4 = vcmp.eq.f32.partialorder %v295_v7, %v334_v36  ;;  %v379_v27 = vadd.f32 %v378_v22, %v377_v14 }
  0x39   : > { %v453_v38 = vsel %vm445_vm4, %v452_v35, 4 }
  0x3a   : > { %v337_v39 = vmul.f32 1.442695, %v336_v37  ;;  %v454_v40 = vcombine.high %v453_v38, %v453_v38  ;;  %v455_v41 = vsel %vm317_vm1, %v453_v38, 2147483647  ;;  %v380_v29 = vrot.slane %v379_v27, 2 }
  0x3b   : > { %v456_v42 = vrot.slane %v455_v41, 4 }
  0x3c   : > { %712 = vpow2.f32 %v337_v39  ;;  %v465_v43 = vsel %vm317_vm1, %v454_v40, 2147483647  ;;  %v381_v31 = vadd.f32 %v380_v29, %v379_v27 }
  0x3d   : > { %v466_v44 = vrot.slane %v465_v43, 4  ;;  %vm457_vm5 = vcmp.lt.s32.totalorder %v455_v41, %v456_v42 }
  0x3e   : > { %v458_v45 = vsel %vm457_vm5, %v455_v41, %v456_v42  ;;  %v382_v35 = vrot.slane %v381_v31, 1 }
  0x3f   : > { %vm467_vm6 = vcmp.lt.s32.totalorder %v465_v43, %v466_v44  ;;  %v459_v46 = vrot.slane %v458_v45, 2 }
  0x40   : > { %v468_v47 = vsel %vm467_vm6, %v465_v43, %v466_v44  ;;  %v383_v42 = vadd.f32 %v382_v35, %v381_v31 }
  0x41   : > { %v469_v50 = vrot.slane %v468_v47, 2  ;;  %vm460_vm7 = vcmp.lt.s32.totalorder %v458_v45, %v459_v46 }
  0x42   : > { %v461_v51 = vsel %vm460_vm7, %v458_v45, %v459_v46 }
  0x43   : > { %vm470_vm8 = vcmp.lt.s32.totalorder %v468_v47, %v469_v50  ;;  %v462_v52 = vrot.slane %v461_v51, 1 }
  0x44   : > { %v471_v53 = vsel %vm470_vm8, %v468_v47, %v469_v50 }
  0x45   : > { %v472_v55 = vrot.slane %v471_v53, 1  ;;  %vm463_vm9 = vcmp.lt.s32.totalorder %v461_v51, %v462_v52 }
  0x46   : > { %v464_v56 = vsel %vm463_vm9, %v461_v51, %v462_v52 }
  0x47   : > { %vm473_vm10 = vcmp.lt.s32.totalorder %v471_v53, %v472_v55  ;;  %vm475_vm11 = vcmp.eq.s32.totalorder %v464_v56, %v935_v9  ;;  %v481_v9 = vld [vmem:[%s922_s30] sm:$0x3] }
  0x48   : > { %v474_v57 = vsel %vm473_vm10, %v471_v53, %v472_v55  ;;  %v479_v60 = vsel %vm475_vm11, 1, %v799_v1 }
  0x49   : > { %v713_v58 = vpop.eup %712  ;;  %vm476_vm12 = vcmp.eq.s32.totalorder %v474_v57, %v937_v10  ;;  %v370_v10 = vsel %vm317_vm1, %v366_v26, 0.0 }
  0x4a   : > { %v340_v61 = vcombine.high %v713_v58, %v713_v58  ;;  %v342_v62 = vsel %vm317_vm1, %v713_v58, 0.0  ;;  %v480_v63 = vsel %vm476_vm12, 1, %v799_v1  ;;  %v371_v16 = vrot.slane %v370_v10, 4 }
  0x4b   : > { %v343_v0 = vrot.slane %v342_v62, 4  ;;  %v482_v4 = vcombine.low %v479_v60, %v480_v63 }
  0x4c   : > { %v349_v5 = vsel %vm317_vm1, %v340_v61, 0.0  ;;  %v372_v25 = vadd.f32 %v371_v16, %v370_v10 }
  0x4d   : > { %v344_v7 = vadd.f32 %v343_v0, %v342_v62  ;;  %v350_v8 = vrot.slane %v349_v5, 4  ;;  %v489_v2 = vrot.slane %v482_v4, %v963_v59 }
  0x4e   : > { %v373_v28 = vrot.slane %v372_v25, 2 }
  0x4f   : > { %v345_v11 = vrot.slane %v344_v7, 2  ;;  %v351_v12 = vadd.f32 %v350_v8, %v349_v5  ;;  %v496_v13 = vrot.slane %v489_v2, %v963_v59 }
  0x50   : > { %v374_v30 = vadd.f32 %v373_v28, %v372_v25 }
  0x51   : > { %v346_v1 = vadd.f32 %v345_v11, %v344_v7  ;;  %v352_v15 = vrot.slane %v351_v12, 2  ;;  %v497_v17 = vadd.s32 %v496_v13, %v481_v9 }
  0x52   : > { %v375_v32 = vrot.slane %v374_v30, 1 }
  0x53   : > { %v347_v20 = vrot.slane %v346_v1, 1  ;;  %v353_v21 = vadd.f32 %v352_v15, %v351_v12  ;;  %498 = vst.msk [vmem:[%s922_s30] sm:$0x3] %vm910_vm0, %v497_v17 }
  0x54   : > { %v376_v38 = vadd.f32 %v375_v32, %v374_v30 }
  0x55   : > { %v348_v23 = vadd.f32 %v347_v20, %v346_v1  ;;  %v354_v24 = vrot.slane %v353_v21, 1 }
  0x57   : > { %v355_v26 = vadd.f32 %v354_v24, %v353_v21  ;;  %714 = vlog2.f32 %v348_v23 }
  0x59   : > { %716 = vlog2.f32 %v355_v26 }
  0x64   : > { %v715_v36 = vpop.eup %714 }
  0x65   : > { %v357_v37 = vmul.f32 0.6931472, %v715_v36 }
  0x66   : > { %v717_v39 = vpop.eup %716 }
  0x67   : > { %v359_v40 = vmul.f32 0.6931472, %v717_v39  ;;  %v360_v41 = vadd.f32 %v357_v37, %v952_v33 }
  0x69   : > { %v361_v43 = vadd.f32 %v359_v40, %v954_v34  ;;  %v416_v44 = vsub.f32 %v360_v41, %v376_v38 }
  0x6b   : > { %v417_v45 = vsub.f32 %v361_v43, %v383_v42 }
  0xa2   : > { %v387_v46 = vpop.permute.xlu0 %386 }
  0xa3   : > { %v389_v47 = vmul.f32 %v945_v18, %v387_v46  ;;  %v390_v48 = vmul.f32 %v947_v19, %v387_v46 }
  0xa5   : > { %v391_v49 = vsel %vm317_vm1, %v389_v47, 0.0  ;;  %v398_v50 = vsel %vm317_vm1, %v390_v48, 0.0 }
  0xa6   : > { %v392_v51 = vrot.slane %v391_v49, 4  ;;  %v399_v52 = vrot.slane %v398_v50, 4 }
  0xa8   : > { %v393_v53 = vadd.f32 %v392_v51, %v391_v49  ;;  %v400_v54 = vadd.f32 %v399_v52, %v398_v50 }
  0xaa   : > { %v394_v33 = vrot.slane %v393_v53, 2  ;;  %v401_v55 = vrot.slane %v400_v54, 2 }
  0xac   : > { %v395_v56 = vadd.f32 %v394_v33, %v393_v53  ;;  %v402_v34 = vadd.f32 %v401_v55, %v400_v54 }
  0xae   : > { %v396_v57 = vrot.slane %v395_v56, 1  ;;  %v403_v58 = vrot.slane %v402_v34, 1 }
  0xb0   : > { %v397_v60 = vadd.f32 %v396_v57, %v395_v56  ;;  %v404_v61 = vadd.f32 %v403_v58, %v402_v34 }
  0xb2   : > { %v414_v18 = vmul.f32 0.7, %v397_v60  ;;  %v415_v62 = vmul.f32 0.7, %v404_v61 }
  0xb4   : > { %v418_v19 = vmul.f32 %v416_v44, %v414_v18  ;;  %v419_v63 = vmul.f32 %v417_v45, %v415_v62 }
  0xb6   : > { %v424_v0 = vcombine.low %v418_v19, %v419_v63 }
  0xb8   : > { %v431_v4 = vrot.slane %v424_v0, %v963_v59 }
  0xba   : > { %v438_v5 = vrot.slane %v431_v4, %v963_v59 }
  0xbc   : > { %444 = vst.msk [vmem:[%s280_s11] sm:$0x3] %vm910_vm0, %v438_v5 }
  0xbd PF: > { %s18_s20 = sadd.s32 1, %s796_s20   ;;  %s1020_s15 = smov %s780_s16 }
  0xbe   : > { %p15_p7 = scmp.ge.s32.totalorder %s18_s20, 4   ;;  %s1021_s16 = smov %s784_s17 }
  0xbf   : > { %s1022_s17 = smov %s877_s27  ;;  %s1023_s18 = smov %s792_s19 }
  0xc0   : > { %s1024_s19 = smov %s1026_s22  ;;  %17 = sbr.rel (!%p15_p7) target bundleno = 4 (0x4), region = 91 }
  0xc5   :  { %541 = vsyncpa [#allocation3], 1 }
  0xc6   :  { %543 = vsyncpa [#allocation3 + $0x1], 1 }

</bundles_post_ra>
